<compile_context>
chip_gen: v6e
topology: v6e:2x2x1
jax: 0.10.0
libtpu: 0.0.40
codegen_flags: <defaults>
</compile_context>

<pallas_src>
import jax
import jax.numpy as jnp
from jax.experimental import pallas as pl
from jax.experimental.pallas import tpu as pltpu


def _round_up(x, m):
    return ((x + m - 1) // m) * m


def _fpn_predictor_kernel(x_ref, w_ref, b_ref, out_ref):
    # Single fused MXU pass: [TN, C] @ [C, OUTP] (f32 accumulate) + bias.
    out_ref[...] = (
        jnp.dot(x_ref[...], w_ref[...], preferred_element_type=jnp.float32)
        + b_ref[...]
    ).astype(out_ref.dtype)


def prepare_fpn_predictor_params(cls_w, cls_b, bbox_w, bbox_b,
                                 compute_dtype=jnp.bfloat16):
    """One-time param repack (call at init, not per forward).

    PyTorch Linear layout (out, in) -> fused, transposed, lane-padded:
      w_fused: (C, OUTP) in compute_dtype, OUTP = round_up(nc + nb, 128)
      b_fused: (1, OUTP) float32
    Returns (w_fused, b_fused, num_classes, num_bbox_out).
    """
    nc = cls_w.shape[0]
    nb = bbox_w.shape[0]
    out = nc + nb
    out_p = _round_up(out, 128)

    w = jnp.concatenate([cls_w.T, bbox_w.T], axis=1)              # (C, nc+nb)
    b = jnp.concatenate([cls_b, bbox_b], axis=0).reshape(1, out)  # (1, nc+nb)

    w = jnp.pad(w, ((0, 0), (0, out_p - out))).astype(compute_dtype)
    b = jnp.pad(b, ((0, 0), (0, out_p - out))).astype(jnp.float32)
    return w, b, nc, nb


def fpn_predictor_forward(x, w_fused, b_fused, num_classes, num_bbox_out,
                          tile_n=256):
    """FPNPredictor.forward.

    x:        (N, C) or (N, C, 1, 1)
    w_fused:  (C, OUTP)   from prepare_fpn_predictor_params
    b_fused:  (1, OUTP)
    returns:  (scores (N, num_classes), bbox_deltas (N, num_bbox_out)) in f32
    """
    if x.ndim == 4:
        assert x.shape[2] == 1 and x.shape[3] == 1
        x = x.reshape(x.shape[0], -1)

    N, C = x.shape
    out_p = w_fused.shape[1]
    compute_dtype = w_fused.dtype

    # Row tile: multiple of 8 sublanes, capped at tile_n; pad N up to a full
    # number of tiles so every grid step sees a full, aligned block.
    tn = min(tile_n, _round_up(max(N, 8), 8))
    n_pad = _round_up(N, tn)
    xp = x if n_pad == N else jnp.pad(x, ((0, n_pad - N), (0, 0)))
    xp = xp.astype(compute_dtype)

    grid = (n_pad // tn,)

    # VMEM budget: double-buffered x & out tiles + resident fused weights/bias.
    x_item = jnp.dtype(compute_dtype).itemsize
    vmem_needed = (2 * tn * C * x_item            # x tiles (double buffered)
                   + C * out_p * x_item           # fused weights (resident)
                   + out_p * 4                    # bias (resident)
                   + 2 * tn * out_p * 4)          # out tiles (double buffered)
    vmem_limit = min(int(vmem_needed * 1.5) + (4 << 20), 64 << 20)

    out = pl.pallas_call(
        _fpn_predictor_kernel,
        out_shape=jax.ShapeDtypeStruct((n_pad, out_p), jnp.float32),
        grid=grid,
        in_specs=[
            pl.BlockSpec((tn, C), lambda i: (i, 0)),        # x: tiled over N
            pl.BlockSpec((C, out_p), lambda i: (0, 0)),     # weights: resident
            pl.BlockSpec((1, out_p), lambda i: (0, 0)),     # bias: resident
        ],
        out_specs=pl.BlockSpec((tn, out_p), lambda i: (i, 0)),
        compiler_params=pltpu.CompilerParams(
            dimension_semantics=("parallel",),
            vmem_limit_bytes=vmem_limit,
        ),
        cost_estimate=pl.CostEstimate(
            flops=2 * n_pad * C * out_p,
            transcendentals=0,
            bytes_accessed=(xp.size * x_item
                            + w_fused.size * x_item
                            + b_fused.size * 4
                            + n_pad * out_p * 4),
        ),
    )(xp, w_fused, b_fused)

    scores = out[:N, :num_classes]
    bbox_deltas = out[:N, num_classes:num_classes + num_bbox_out]
    return scores, bbox_deltas


def init_fpn_predictor_params(key, in_channels, num_classes,
                              cls_agnostic_bbox_reg=False,
                              dtype=jnp.float32):
    """Deterministic init mirroring FPNPredictor.__init__ (PyTorch layout)."""
    representation_size = in_channels
    num_bbox_reg_classes = 2 if cls_agnostic_bbox_reg else num_classes
    k1, k2 = jax.random.split(key)
    cls_w = 0.01 * jax.random.normal(k1, (num_classes, representation_size),
                                     dtype=dtype)
    cls_b = jnp.zeros((num_classes,), dtype=dtype)
    bbox_w = 0.001 * jax.random.normal(
        k2, (num_bbox_reg_classes * 4, representation_size), dtype=dtype)
    bbox_b = jnp.zeros((num_bbox_reg_classes * 4,), dtype=dtype)
    return cls_w, cls_b, bbox_w, bbox_b


if __name__ == "__main__":
    key = jax.random.PRNGKey(0)
    kp, kx, kp2, kx2 = jax.random.split(key, 4)

    # --- Case 1: small module-consistent shapes, 4D input (flatten path) ---
    N, C, NUM_CLASSES = 8, 32, 8
    cls_w, cls_b, bbox_w, bbox_b = init_fpn_predictor_params(
        kp, in_channels=C, num_classes=NUM_CLASSES, cls_agnostic_bbox_reg=False)
    w_fused, b_fused, nc, nb = prepare_fpn_predictor_params(
        cls_w, cls_b, bbox_w, bbox_b)

    x = jax.random.normal(kx, (N, C, 1, 1), dtype=jnp.float32)
    scores, bbox_deltas = fpn_predictor_forward(x, w_fused, b_fused, nc, nb)
    jax.block_until_ready((scores, bbox_deltas))

    x2 = x.reshape(N, C)
    ref_scores = x2 @ cls_w.T + cls_b
    ref_bbox = x2 @ bbox_w.T + bbox_b
    assert scores.shape == (N, NUM_CLASSES)
    assert bbox_deltas.shape == (N, NUM_CLASSES * 4)
    # bf16 MXU operands with f32 accumulation -> loosen tolerance accordingly.
    assert jnp.allclose(scores, ref_scores, atol=5e-3, rtol=5e-2)
    assert jnp.allclose(bbox_deltas, ref_bbox, atol=5e-3, rtol=5e-2)

    # --- Case 2: non-multiple-of-8 N, class-agnostic bbox, 2D input ---
    N2, C2, NUM_CLASSES2 = 19, 64, 5
    cls_w2, cls_b2, bbox_w2, bbox_b2 = init_fpn_predictor_params(
        kp2, in_channels=C2, num_classes=NUM_CLASSES2,
        cls_agnostic_bbox_reg=True)
    w_fused2, b_fused2, nc2, nb2 = prepare_fpn_predictor_params(
        cls_w2, cls_b2, bbox_w2, bbox_b2)

    xb = jax.random.normal(kx2, (N2, C2), dtype=jnp.float32)
    scores2, bbox2 = fpn_predictor_forward(xb, w_fused2, b_fused2, nc2, nb2)
    jax.block_until_ready((scores2, bbox2))

    ref_scores2 = xb @ cls_w2.T + cls_b2
    ref_bbox2 = xb @ bbox_w2.T + bbox_b2
    assert scores2.shape == (N2, NUM_CLASSES2)
    assert bbox2.shape == (N2, 2 * 4)
    assert jnp.allclose(scores2, ref_scores2, atol=5e-3, rtol=5e-2)
    assert jnp.allclose(bbox2, ref_bbox2, atol=5e-3, rtol=5e-2)

    print("KERNEL_OK")
</pallas_src>

<mosaic_0001>
module attributes {stable_mosaic.version = 11 : i64} {
  func.func @_fpn_predictor_kernel(%arg0: i32, %arg1: memref<8x32xbf16, #tpu.memory_space<vmem>>, %arg2: memref<32x128xbf16, #tpu.memory_space<vmem>>, %arg3: memref<1x128xf32, #tpu.memory_space<vmem>>, %arg4: memref<8x128xf32, #tpu.memory_space<vmem>>) attributes {dimension_semantics = [#tpu.dimension_semantics<parallel>], iteration_bounds = array<i64: 1>, scalar_prefetch = 0 : i64, scratch_operands = 0 : i64, tpu.core_type = #tpu.core_type<tc>, window_params = [{transform_indices = @transform_0, window_bounds = array<i64: 8, 32>}, {pipeline_mode = #tpu.pipeline_mode<synchronous>, transform_indices = @transform_1, window_bounds = array<i64: 32, 128>}, {pipeline_mode = #tpu.pipeline_mode<synchronous>, transform_indices = @transform_2, window_bounds = array<i64: 1, 128>}, {transform_indices = @transform_3, window_bounds = array<i64: 8, 128>}]} {
    %c0 = arith.constant 0 : index
    %c0_0 = arith.constant 0 : index
    %0 = vector.load %arg1[%c0, %c0_0] : memref<8x32xbf16, #tpu.memory_space<vmem>>, vector<8x32xbf16>
    %c0_1 = arith.constant 0 : index
    %c0_2 = arith.constant 0 : index
    %1 = vector.load %arg2[%c0_1, %c0_2] : memref<32x128xbf16, #tpu.memory_space<vmem>>, vector<32x128xbf16>
    %cst = arith.constant dense<0.000000e+00> : vector<8x128xf32>
    %2 = tpu.matmul %0, %1, %cst {dimension_numbers = #tpu.dot_dimension_numbers<[1], [0], [0], [1], [0, 0, 1, 1], [], []>} : vector<8x32xbf16>, vector<32x128xbf16>, vector<8x128xf32> -> vector<8x128xf32>
    %c0_3 = arith.constant 0 : index
    %c0_4 = arith.constant 0 : index
    %3 = vector.load %arg3[%c0_3, %c0_4] : memref<1x128xf32, #tpu.memory_space<vmem>>, vector<1x128xf32>
    %4 = vector.broadcast %3 : vector<1x128xf32> to vector<8x128xf32>
    %5 = arith.addf %2, %4 : vector<8x128xf32>
    %c0_5 = arith.constant 0 : index
    %c0_6 = arith.constant 0 : index
    %6 = vector.load %arg4[%c0_5, %c0_6] : memref<8x128xf32, #tpu.memory_space<vmem>>, vector<8x128xf32>
    tpu.vector_store %arg4[%c0_5, %c0_6], %5 {strides = array<i32>} : memref<8x128xf32, #tpu.memory_space<vmem>>, vector<8x128xf32>,
    return
  }
  func.func @transform_0(%arg0: i32) -> (i32, i32) {
    %c0_i32 = arith.constant 0 : i32
    %c0_i32_0 = arith.constant 0 : i32
    return %arg0, %c0_i32 : i32, i32
  }
  func.func @transform_1(%arg0: i32) -> (i32, i32) {
    %c0_i32 = arith.constant 0 : i32
    %c0_i32_0 = arith.constant 0 : i32
    %c0_i32_1 = arith.constant 0 : i32
    return %c0_i32, %c0_i32_0 : i32, i32
  }
  func.func @transform_2(%arg0: i32) -> (i32, i32) {
    %c0_i32 = arith.constant 0 : i32
    %c0_i32_0 = arith.constant 0 : i32
    %c0_i32_1 = arith.constant 0 : i32
    return %c0_i32, %c0_i32_0 : i32, i32
  }
  func.func @transform_3(%arg0: i32) -> (i32, i32) {
    %c0_i32 = arith.constant 0 : i32
    %c0_i32_0 = arith.constant 0 : i32
    return %arg0, %c0_i32 : i32, i32
  }
}

</mosaic_0001>

<bundles_post_ra>
// kernel: tpu_custom_call.1
= control target key start
LH: loop header
LB: loop body
LE: loop exit
PB: predicated region body
PF: predicated region fallthrough
CT: control target
= control target key end

     0   :  { %8 = vsyncpa [#allocation3], 0  ;;  %s256_s0 = inlined_call_operand.hbm [shape: bf16[8,32], index: 0, kind: input, shape index: {}]   ;;  %s257_s1 = inlined_call_operand.hbm [shape: bf16[32,128], index: 1, kind: input, shape index: {}]   ;;  %s258_s2 = inlined_call_operand.vmem [shape: f32[1,128], index: 2, kind: input, shape index: {}]   ;;  %s259_s3 = inlined_call_operand.hbm [shape: f32[8,128], index: 3, kind: output, shape index: {}]  }
   0x1   :  { %9 = vsyncpa [#allocation6], 0 }
   0x2   :  { %10 = vsyncpa [#allocation4], 0  ;;  %s217_s12 = smov [#allocation2]   ;;  %s218_s14 = smov [#allocation5]  }
   0x3   :  { %s17_s13 = sshll.u32 %s217_s12, 4  ;;  %s26_s15 = sshll.u32 %s218_s14, 4  ;;  %s18_s13 = int_to_ptr.vmem [resolvable:$true] %s17_s13  ;;  %s27_s15 = int_to_ptr.vmem [resolvable:$true] %s26_s15 }
   0x4   :  { %s159_s16 = scalar_lea.vmem %s18_s13, 64  ;;  %p164_p1 = scmp.lt.s32.totalorder %s18_s13, %s18_s13 }
   0x5   :  { %p160_p0 = scmp.ne.s32.totalorder %s18_s13, %s159_s16  ;;  %p165_p2 = scmp.lt.s32.totalorder %s159_s16, %s159_s16 }
   0x7   :  { %p166_p3 = por %p165_p2, %p164_p1 }
   0x9   :  { %p167_p4 = pnand %p166_p3, %p160_p0 }
   0xb   :  { %170 = shalt.err (!%p167_p4)
}
   0xc   :  { %20 = dma.hbm_to_vmem [thread:$0]  %s256_s0, 64, %s18_s13, [#allocation3]  }
   0xd   :  { %s179_s19 = scalar_lea.vmem %s27_s15, 256  ;;  %p184_p6 = scmp.lt.s32.totalorder %s27_s15, %s27_s15 }
   0xe   :  { %p180_p5 = scmp.ne.s32.totalorder %s27_s15, %s179_s19  ;;  %p185_p7 = scmp.lt.s32.totalorder %s179_s19, %s179_s19 }
  0x10   :  { %p186_p8 = por %p185_p7, %p184_p6 }
  0x12   :  { %p187_p9 = pnand %p186_p8, %p180_p5 }
  0x14   :  { %190 = shalt.err (!%p187_p9)
}
  0x15   :  { %s219_s20 = smov 64   ;;  %s220_s21 = smov 4  }
  0x16   :  { %32 = dma.hbm_to_vmem [thread:$0]  %s257_s1, 256, %s27_s15, [#allocation6], %s219_s20, %s219_s20, %s220_s21  }
  0x17   :  { %211 = dma.done.wait [#allocation3], 64  }
  0x18   :  { %212 = vsyncadd [#allocation3], 4294967232 }
  0x19   :  { %213 = dma.done.wait [#allocation6], 256  }
  0x1a   :  { %214 = vsyncadd [#allocation6], 4294967040  ;;  %v221_v0 = vmov 0.0   ;;  %vm222_vm0 = vmmov 0   ;;  %v149_v1 = vld [vmem:[#allocation5 + $0x8] sm:$0xff]   ;;  %v150_v2 = vld [vmem:[#allocation5] sm:$0xff]  }
  0x1b   :  { %134 = vmatprep.subr.bf16.mxu0 %v221_v0  ;;  %138 = vmatprep.mubr.msk.bf16.mxu0 %vm222_vm0, %v221_v0  ;;  %v42_v3 = vld [vmem:[#allocation2] sm:$0xf]  ;;  %vm66_vm1 = vcmask 261120   ;;  %s223_s1 = smov [#allocation7]  }
  0x1c   :  { %135 = vmatpush3.bf16.msra.mxu0 %v149_v1  ;;  %v127_v4 = vld [vmem:[%s258_s2] ss:$0 sm:$0xff]  ;;  %s117_s25 = sshll.u32 %s223_s1, 4  ;;  %s118_s25 = int_to_ptr.vmem [resolvable:$true] %s117_s25 }
  0x1d   :  { %136 = vmatprep.subr.bf16.mxu0 %v221_v0  ;;  %s191_s26 = scalar_lea.vmem %s118_s25, 128  ;;  %p196_p11 = scmp.lt.s32.totalorder %s118_s25, %s118_s25 }
  0x1e   :  { %p192_p10 = scmp.ne.s32.totalorder %s118_s25, %s191_s26  ;;  %p197_p12 = scmp.lt.s32.totalorder %s191_s26, %s191_s26 }
  0x20   :  { %137 = vmatpush3.bf16.msra.mxu0 %v150_v2  ;;  %p198_p13 = por %p197_p12, %p196_p11 }
  0x22   :  { %p199_p0 = pnand %p198_p13, %p192_p10 }
  0x23   :  { %139 = vmatmul.mubr.msk.bf16.vlgmr.msra.gmra.mxu0 %vm66_vm1, %v42_v3 }
  0xe3   :  { %v104_v5 = vpop.f32.mrf.mxu0 }
  0xe4   :  { %v105_v6 = vadd.f32 %v127_v4, %v104_v5 }
  0xe5   :  { %v140_v7 = vpop.f32.mrf.mxu0 }
  0xe6   :  { %110 = vst [vmem:[#allocation7] sm:$0xff] %v105_v6 }
  0xe7   :  { %v107_v8 = vpop.f32.mrf.mxu0 }
  0xe8   :  { %202 = shalt.err (!%p199_p0)
}
  0xe9   :  { %120 = dma.vmem_to_hbm [thread:$0]  %s118_s25, 128, %s259_s3, [#allocation4]   ;;  %v141_v9 = vpop.f32.mrf.mxu0 }
  0xea   :  { %215 = dma.done.wait [#allocation4], 128  }
  0xeb   :  { %216 = vsyncadd [#allocation4], 4294967168 }
  0xec   :  { %124 = vsyncpa [#allocation3], 1 }
  0xed   :  { %125 = vsyncpa [#allocation6], 1 }
  0xee   :  { %126 = vsyncpa [#allocation4], 1 }

</bundles_post_ra>
